<compile_context>
chip_gen: v7x
topology: tpu7x:2x2x1
jax: 0.10.0
libtpu: 0.0.40
codegen_flags: <defaults>
</compile_context>

<pallas_src>
import jax
import jax.numpy as jnp
from jax.experimental import pallas as pl
from jax.experimental.pallas import tpu as pltpu  # noqa: F401  (TPU backend)


def _agent_kernel(x_ref, w1_ref, b1_ref, w2_ref, b2_ref, o_ref):
    """Fused conv1x1 -> relu -> conv1x1 -> sigmoid over the whole batch at once.

    x_ref : (N*inc,  HW) VMEM   lane axis = HW (lane-dense, 256 = 2*128)
    w1_ref: (N*immc, N*inc)  VMEM   block-diag layer-1 weights
    b1_ref: (N*immc, 1)      VMEM
    w2_ref: (N*outc, N*immc) VMEM   block-diag layer-2 weights
    b2_ref: (N*outc, 1)      VMEM
    o_ref : (N*outc, HW)     VMEM
    """
    x = x_ref[...]                                            # (8, 256)

    # layer 1: MXU matmul + bias + relu on one full (8,256) tile
    z = jnp.dot(w1_ref[...], x,
                preferred_element_type=jnp.float32,
                precision=jax.lax.Precision.HIGHEST)
    z = jnp.maximum(z + b1_ref[...], 0.0)                     # (8, 256)

    # layer 2: MXU matmul + bias, then exact sigmoid on one (4,256) tile
    d = jnp.dot(w2_ref[...], z,
                preferred_element_type=jnp.float32,
                precision=jax.lax.Precision.HIGHEST)
    d = d + b2_ref[...]                                       # (4, 256)

    # exact sigmoid (EUP exp + exact divide); single lane-dense unmasked store
    o_ref[...] = 1.0 / (1.0 + jnp.exp(-d))


def unit_agent_uni_1x1_forward(x_nchw, w1, b1, w2, b2, nimm=0):
    """x_nchw: (N, inc, H, W); w1: (immc, inc, 1, 1); w2: (outc, immc, 1, 1)."""
    if nimm != 0:
        # TODO(synk): nimm > 0 (intermediate 3x3 convs) path not implemented.
        raise NotImplementedError("unit_agent_uni_1x1 Pallas kernel only supports nimm=0")

    N, inc, H, W = x_nchw.shape
    immc = w1.shape[0]
    outc = w2.shape[0]
    HW = H * W

    # Pure reshape (NCHW memory order kept -> n-major then channel): no transpose.
    x2 = x_nchw.reshape(N * inc, HW).astype(jnp.float32)      # (8, 256)

    # Block-diagonal batched weights: kron(I_N, W)  -> one matmul covers the whole batch.
    eye_n = jnp.eye(N, dtype=jnp.float32)
    w1_bd = jnp.kron(eye_n, w1.reshape(immc, inc).astype(jnp.float32))   # (N*immc, N*inc)
    w2_bd = jnp.kron(eye_n, w2.reshape(outc, immc).astype(jnp.float32))  # (N*outc, N*immc)
    b1_bd = jnp.tile(b1.reshape(immc).astype(jnp.float32), N).reshape(N * immc, 1)
    b2_bd = jnp.tile(b2.reshape(outc).astype(jnp.float32), N).reshape(N * outc, 1)

    # Single kernel invocation: no grid, whole arrays resident in VMEM (total << 1 MiB).
    out2 = pl.pallas_call(
        _agent_kernel,
        out_shape=jax.ShapeDtypeStruct((N * outc, HW), jnp.float32),
    )(x2, w1_bd, b1_bd, w2_bd, b2_bd)

    # (N*outc, HW) -> (N, outc, H, W): free reshape (already n-major, channel-major).
    return out2.reshape(N, outc, H, W)


def _kaiming_normal(key, shape):
    # nn.init.kaiming_normal_ default: fan_in mode, a=0 -> std = sqrt(2 / fan_in)
    fan_in = shape[1] * shape[2] * shape[3]
    std = (2.0 / fan_in) ** 0.5
    return std * jax.random.normal(key, shape, dtype=jnp.float32)


if __name__ == "__main__":
    # Module config: inc=4, outc=2, nimm=0 (default), immc=4 (default)
    inc, outc, immc = 4, 2, 4
    N, H, W = 2, 16, 16

    key = jax.random.PRNGKey(0)
    kx, kw1, kw2 = jax.random.split(key, 3)

    x = jax.random.normal(kx, (N, inc, H, W), dtype=jnp.float32)
    w1 = _kaiming_normal(kw1, (immc, inc, 1, 1))
    b1 = jnp.full((immc,), 0.01, dtype=jnp.float32)
    w2 = _kaiming_normal(kw2, (outc, immc, 1, 1))
    b2 = jnp.full((outc,), 0.01, dtype=jnp.float32)

    probs = unit_agent_uni_1x1_forward(x, w1, b1, w2, b2)
    jax.block_until_ready(probs)

    # Reference in plain JAX (highest precision so the comparison isolates kernel error).
    hp = jax.lax.Precision.HIGHEST
    z_ref = jnp.maximum(
        jnp.einsum('nchw,oc->nohw', x, w1.reshape(immc, inc), precision=hp)
        + b1[None, :, None, None], 0.0)
    d_ref = (jnp.einsum('nchw,oc->nohw', z_ref, w2.reshape(outc, immc), precision=hp)
             + b2[None, :, None, None])
    ref = jax.nn.sigmoid(d_ref)

    assert probs.shape == (N, outc, H, W)
    assert jnp.max(jnp.abs(probs - ref)) < 1e-4

    print("KERNEL_OK")
</pallas_src>

<mosaic_0001>
module attributes {stable_mosaic.version = 11 : i64} {
  func.func @_agent_kernel(%arg0: memref<8x256xf32, #tpu.memory_space<vmem>>, %arg1: memref<8x8xf32, #tpu.memory_space<vmem>>, %arg2: memref<8x1xf32, #tpu.memory_space<vmem>>, %arg3: memref<4x8xf32, #tpu.memory_space<vmem>>, %arg4: memref<4x1xf32, #tpu.memory_space<vmem>>, %arg5: memref<4x256xf32, #tpu.memory_space<vmem>>) attributes {dimension_semantics = [], scalar_prefetch = 0 : i64, scratch_operands = 0 : i64, tpu.core_type = #tpu.core_type<tc>} {
    %c0 = arith.constant 0 : index
    %c0_0 = arith.constant 0 : index
    %0 = vector.load %arg0[%c0, %c0_0] : memref<8x256xf32, #tpu.memory_space<vmem>>, vector<8x256xf32>
    %c0_1 = arith.constant 0 : index
    %c0_2 = arith.constant 0 : index
    %1 = vector.load %arg1[%c0_1, %c0_2] : memref<8x8xf32, #tpu.memory_space<vmem>>, vector<8x8xf32>
    %cst = arith.constant dense<0.000000e+00> : vector<8x256xf32>
    %2 = tpu.matmul %1, %0, %cst {dimension_numbers = #tpu.dot_dimension_numbers<[1], [0], [0], [1], [0, 0, 1, 1], [], []>, precision = #tpu.contract_precision<fp32>} : vector<8x8xf32>, vector<8x256xf32>, vector<8x256xf32> -> vector<8x256xf32>
    %c0_3 = arith.constant 0 : index
    %c0_4 = arith.constant 0 : index
    %3 = vector.load %arg2[%c0_3, %c0_4] : memref<8x1xf32, #tpu.memory_space<vmem>>, vector<8x1xf32>
    %4 = vector.broadcast %3 : vector<8x1xf32> to vector<8x256xf32>
    %5 = arith.addf %2, %4 : vector<8x256xf32>
    %cst_5 = arith.constant 0.000000e+00 : f32
    %6 = vector.broadcast %cst_5 : f32 to vector<8x256xf32>
    %7 = arith.maximumf %5, %6 : vector<8x256xf32>
    %c0_6 = arith.constant 0 : index
    %c0_7 = arith.constant 0 : index
    %8 = vector.load %arg3[%c0_6, %c0_7] : memref<4x8xf32, #tpu.memory_space<vmem>>, vector<4x8xf32>
    %cst_8 = arith.constant dense<0.000000e+00> : vector<4x256xf32>
    %9 = tpu.matmul %8, %7, %cst_8 {dimension_numbers = #tpu.dot_dimension_numbers<[1], [0], [0], [1], [0, 0, 1, 1], [], []>, precision = #tpu.contract_precision<fp32>} : vector<4x8xf32>, vector<8x256xf32>, vector<4x256xf32> -> vector<4x256xf32>
    %c0_9 = arith.constant 0 : index
    %c0_10 = arith.constant 0 : index
    %10 = vector.load %arg4[%c0_9, %c0_10] : memref<4x1xf32, #tpu.memory_space<vmem>>, vector<4x1xf32>
    %11 = vector.broadcast %10 : vector<4x1xf32> to vector<4x256xf32>
    %12 = arith.addf %9, %11 : vector<4x256xf32>
    %cst_11 = arith.constant 0.000000e+00 : f32
    %13 = vector.broadcast %cst_11 : f32 to vector<4x256xf32>
    %14 = arith.subf %13, %12 : vector<4x256xf32>
    %15 = math.exp %14 : vector<4x256xf32>
    %cst_12 = arith.constant 1.000000e+00 : f32
    %16 = vector.broadcast %cst_12 : f32 to vector<4x256xf32>
    %17 = arith.addf %16, %15 : vector<4x256xf32>
    %cst_13 = arith.constant 1.000000e+00 : f32
    %18 = vector.broadcast %cst_13 : f32 to vector<4x256xf32>
    %19 = arith.divf %18, %17 : vector<4x256xf32>
    %c0_14 = arith.constant 0 : index
    %c0_15 = arith.constant 0 : index
    %20 = vector.load %arg5[%c0_14, %c0_15] : memref<4x256xf32, #tpu.memory_space<vmem>>, vector<4x256xf32>
    tpu.vector_store %arg5[%c0_14, %c0_15], %19 {strides = array<i32>} : memref<4x256xf32, #tpu.memory_space<vmem>>, vector<4x256xf32>,
    return
  }
}

</mosaic_0001>

<bundles_post_ra>
// kernel: tpu_custom_call.1
= control target key start
LH: loop header
LB: loop body
LE: loop exit
PB: predicated region body
PF: predicated region fallthrough
CT: control target
= control target key end

     0   :  { %10 = vsyncpa [#allocation3], 0  ;;  %s1189_s0 = inlined_call_operand.hbm [shape: f32[8,256], index: 0, kind: input, shape index: {}]   ;;  %s1190_s1 = inlined_call_operand.vmem [shape: f32[8,8], index: 1, kind: input, shape index: {}]   ;;  %s1191_s2 = inlined_call_operand.vmem [shape: f32[8,1], index: 2, kind: input, shape index: {}]   ;;  %s1192_s3 = inlined_call_operand.vmem [shape: f32[4,8], index: 3, kind: input, shape index: {}]   ;;  %s1193_s4 = inlined_call_operand.vmem [shape: f32[4,1], index: 4, kind: input, shape index: {}]   ;;  %s1194_s5 = inlined_call_operand.hbm [shape: f32[4,256], index: 5, kind: output, shape index: {}]  }
   0x1   :  { %11 = vsyncpa [#allocation4], 0  ;;  %s1105_s18 = smov [#allocation2]   ;;  %s1057_s22 = scalar_lea.hbm %s1189_s0, 256 }
   0x2   :  { %s18_s19 = sshll.u32 %s1105_s18, 4  ;;  %p1058_p0 = scmp.ne.s32.totalorder %s1189_s0, %s1057_s22  ;;  %s19_s19 = int_to_ptr.vmem [resolvable:$true] %s18_s19 }
   0x3   :  { %p1061_p1 = scmp.lt.u32.totalorder %s1057_s22, %s1189_s0 }
   0x5   :  { %p1063_p2 = pnand %p1061_p1, %p1058_p0 }
   0x7   :  { %1066 = shalt.err (!%p1063_p2)
}
   0x8   :  { %s1067_s27 = scalar_lea.vmem %s19_s19, 256  ;;  %p1072_p4 = scmp.lt.s32.totalorder %s19_s19, %s19_s19 }
   0x9   :  { %p1068_p3 = scmp.ne.s32.totalorder %s19_s19, %s1067_s27  ;;  %p1073_p5 = scmp.lt.s32.totalorder %s1067_s27, %s1067_s27 }
   0xb   :  { %p1074_p6 = por %p1073_p5, %p1072_p4 }
   0xd   :  { %p1075_p7 = pnand %p1074_p6, %p1068_p3 }
   0xf   :  { %1078 = shalt.err (!%p1075_p7)
}
  0x10   :  { %21 = dma.hbm_to_vmem [thread:$0]  %s1189_s0, 256, %s19_s19, [#allocation3]  }
  0x11   :  { %1101 = dma.done.wait [#allocation3], 256  }
  0x12   :  { %1102 = vsyncadd [#allocation3], 4294967040  ;;  %v1106_v0 = vmov 0.0   ;;  %v1107_v1 = vmov 0   ;;  %vm42_vm0 = vcmask 64512   ;;  %v34_v2 = vld [vmem:[#allocation2 + $0x8] sm:$0xff] }
  0x13   :  { %112 = vmatprep.mubr.f32.mxu0 %v1106_v0  ;;  %1048 = vset.pattern.permute.xlu0 %v1107_v1  ;;  %v33_v3 = vld [vmem:[#allocation2] sm:$0xff]  ;;  %v46_v5 = vand.u32 4294901760, %v34_v2 }
  0x14   :  { %589 = vmatprep.mubr.f32.mxu1 %v1106_v0  ;;  %v35_v4 = vld [vmem:[%s1190_s1] sm:$0xff]  ;;  %v48_v6 = vand.u32 4294901760, %v33_v3 }
  0x15   :  { %v44_v7 = vsel %vm42_vm0, %v35_v4, 0  ;;  %v36_v8 = vld [vmem:[%s1191_s2] sm:$0xff]  ;;  %47 = vmatprep.subr.mxu0 %v46_v5  ;;  %v125_v11 = vsub.f32 %v34_v2, %v46_v5 }
  0x16   :  { %v113_v9 = vand.u32 4294901760, %v44_v7  ;;  %39 = vperm.xlu0 %1048, %v36_v8   ;;  %v131_v10 = vsub.f32 %v33_v3, %v48_v6  ;;  %v514_v12 = vld [vmem:[%s1193_s4] sm:$0xf]  ;;  %49 = vmatpush1.msra.mxu0 %v48_v6 }
  0x17   :  { %v126_v14 = vand.u32 4294901760, %v125_v11  ;;  %v513_v23 = vld [vmem:[%s1192_s3] sm:$0xf]  ;;  %s1108_s3 = smov [#allocation5]  }
  0x18   :  { %v114_v13 = vsub.f32 %v44_v7, %v113_v9  ;;  %v132_v15 = vand.u32 4294901760, %v131_v10  ;;  %v521_v24 = vsel %vm42_vm0, %v513_v23, 0  ;;  %s1011_s4 = sshll.u32 %s1108_s3, 4  ;;  %s1012_s4 = int_to_ptr.vmem [resolvable:$true] %s1011_s4 }
  0x19   :  { %v127_v17 = vsub.f32 %v125_v11, %v126_v14  ;;  %v590_v25 = vand.u32 4294901760, %v521_v24  ;;  %s1079_s10 = scalar_lea.vmem %s1012_s4, 128  ;;  %p1084_p9 = scmp.lt.s32.totalorder %s1012_s4, %s1012_s4 }
  0x1a   :  { %v115_v16 = vand.u32 4294901760, %v114_v13  ;;  %517 = vperm.xlu0 %1048, %v514_v12   ;;  %v133_v18 = vsub.f32 %v131_v10, %v132_v15  ;;  %p1080_p8 = scmp.ne.s32.totalorder %s1012_s4, %s1079_s10  ;;  %p1085_p10 = scmp.lt.s32.totalorder %s1079_s10, %s1079_s10 }
  0x1b   :  { %v128_v20 = vand.u32 4294901760, %v127_v17  ;;  %v591_v26 = vsub.f32 %v521_v24, %v590_v25 }
  0x1c   :  { %v116_v19 = vsub.f32 %v114_v13, %v115_v16  ;;  %v134_v21 = vand.u32 4294901760, %v133_v18  ;;  %p1086_p11 = por %p1085_p10, %p1084_p9 }
  0x1d   :  { %129 = vmatprep.subr.mxu0 %v128_v20  ;;  %v592_v27 = vand.u32 4294901760, %v591_v26 }
  0x1e   :  { %v117_v22 = vand.u32 4294901760, %v116_v19  ;;  %p1087_p12 = pnand %p1086_p11, %p1080_p8 }
  0x1f   :  { %v593_v33 = vsub.f32 %v591_v26, %v592_v27 }
  0x20   :  { %118 = vmatmul.mubr.f32.vlgmr.msra.gmra.mrb[0].mxu0 %v117_v22 }
  0x21   :  { %135 = vmatpush1.msra.mxu0 %v134_v21  ;;  %198 = vmatprep.mubr.f32.mxu0 %v1106_v0  ;;  %v594_v38 = vand.u32 4294901760, %v593_v33 }
  0x22   :  { %208 = vmatprep.subr.mxu0 %v125_v11 }
  0x28   :  { %200 = vmatmul.mubr.f32.vlgmr.msra.gmra.mrb[0].mxu0 %v113_v9 }
  0x29   :  { %211 = vmatpush1.msra.mxu0 %v131_v10  ;;  %274 = vmatprep.mubr.f32.mxu0 %v1106_v0 }
  0x2a   :  { %284 = vmatprep.subr.mxu0 %v46_v5 }
  0x30   :  { %277 = vmatmul.mubr.f32.vlgmr.msra.gmra.mrb[0].mxu0 %v114_v13 }
  0x31   :  { %286 = vmatpush1.msra.mxu0 %v48_v6  ;;  %349 = vmatprep.mubr.f32.mxu0 %v1106_v0 }
  0x32   :  { %362 = vmatprep.subr.mxu0 %v126_v14 }
  0x38   :  { %353 = vmatmul.mubr.f32.vlgmr.msra.gmra.mrb[0].mxu0 %v115_v16 }
  0x39   :  { %366 = vmatpush1.msra.mxu0 %v132_v15  ;;  %429 = vmatprep.mubr.f32.mxu0 %v1106_v0 }
  0x3a   :  { %438 = vmatprep.subr.mxu0 %v46_v5 }
  0x40   :  { %431 = vmatmul.mubr.f32.vlgmr.msra.gmra.mrb[0].mxu0 %v113_v9 }
  0x41   :  { %440 = vmatpush1.msra.mxu0 %v48_v6  ;;  %503 = vmatprep.mubr.f32.mxu0 %v1106_v0 }
  0x48   :  { %505 = vmatmul.mubr.f32.vlgmr.msra.gmra.mrb[0].mxu0 %v113_v9 }
  0x95   :  { %v40_v28 = vpop.permute.xlu0 %39 }
  0x99   :  { %v518_v47 = vpop.permute.xlu0 %517 }
 0x11b   :  { %v506_v29 = vpop.f32.mrb[0].mxu0 }
 0x11c   :  { %v1020_v30 = vadd.f32 %v506_v29, %v40_v28  ;;  %v508_v31 = vpop.f32.mrb[1].mxu0 }
 0x11d   :  { %v1021_v32 = vadd.f32 %v508_v31, %v40_v28 }
 0x11e   :  { %v511_v34 = vmax.f32 %v1020_v30, 0.0 }
 0x11f   :  { %v512_v35 = vmax.f32 %v1021_v32, 0.0 }
 0x120   :  { %v525_v36 = vand.u32 4294901760, %v511_v34 }
 0x121   :  { %v523_v37 = vand.u32 4294901760, %v512_v35 }
 0x122   :  { %v608_v39 = vsub.f32 %v511_v34, %v525_v36 }
 0x123   :  { %v602_v40 = vsub.f32 %v512_v35, %v523_v37  ;;  %524 = vmatprep.subr.mxu1 %v523_v37 }
 0x124   :  { %v609_v41 = vand.u32 4294901760, %v608_v39  ;;  %526 = vmatpush1.msra.mxu1 %v525_v36 }
 0x125   :  { %595 = vmatmul.mubr.f32.vlgmr.msra.gmra.mrb[0].mxu1 %v594_v38  ;;  %v603_v42 = vand.u32 4294901760, %v602_v40 }
 0x126   :  { %v610_v43 = vsub.f32 %v608_v39, %v609_v41  ;;  %675 = vmatprep.mubr.f32.mxu1 %v1106_v0 }
 0x127   :  { %v604_v44 = vsub.f32 %v602_v40, %v603_v42 }
 0x128   :  { %v611_v46 = vand.u32 4294901760, %v610_v43 }
 0x129   :  { %v605_v45 = vand.u32 4294901760, %v604_v44 }
 0x12b   :  { %606 = vmatprep.subr.mxu1 %v605_v45 }
 0x12c   :  { %612 = vmatpush1.msra.mxu1 %v611_v46 }
 0x12d   :  { %677 = vmatmul.mubr.f32.vlgmr.msra.gmra.mrb[0].mxu1 %v590_v25  ;;  %685 = vmatprep.subr.mxu1 %v602_v40 }
 0x12e   :  { %688 = vmatpush1.msra.mxu1 %v608_v39  ;;  %751 = vmatprep.mubr.f32.mxu1 %v1106_v0 }
 0x12f   :  { %761 = vmatprep.subr.mxu1 %v523_v37 }
 0x135   :  { %754 = vmatmul.mubr.f32.vlgmr.msra.gmra.mrb[0].mxu1 %v591_v26 }
 0x136   :  { %763 = vmatpush1.msra.mxu1 %v525_v36  ;;  %826 = vmatprep.mubr.f32.mxu1 %v1106_v0 }
 0x137   :  { %839 = vmatprep.subr.mxu1 %v603_v42 }
 0x13d   :  { %830 = vmatmul.mubr.f32.vlgmr.msra.gmra.mrb[0].mxu1 %v592_v27 }
 0x13e   :  { %843 = vmatpush1.msra.mxu1 %v609_v41  ;;  %906 = vmatprep.mubr.f32.mxu1 %v1106_v0 }
 0x13f   :  { %915 = vmatprep.subr.mxu1 %v523_v37 }
 0x145   :  { %908 = vmatmul.mubr.f32.vlgmr.msra.gmra.mrb[0].mxu1 %v590_v25 }
 0x146   :  { %917 = vmatpush1.msra.mxu1 %v525_v36  ;;  %980 = vmatprep.mubr.f32.mxu1 %v1106_v0 }
 0x14d   :  { %982 = vmatmul.mubr.f32.vlgmr.msra.gmra.mrb[0].mxu1 %v590_v25 }
 0x220   :  { %v983_v48 = vpop.f32.mrb[0].mxu1 }
 0x221   :  { %v1022_v49 = vadd.f32 %v983_v48, %v518_v47  ;;  %v985_v50 = vpop.f32.mrb[1].mxu1 }
 0x222   :  { %v1023_v51 = vadd.f32 %v985_v50, %v518_v47 }
 0x223   :  { %v988_v52 = vsub.f32 0.0, %v1022_v49 }
 0x224   :  { %v989_v53 = vsub.f32 0.0, %v1023_v51 }
 0x225   :  { %v990_v54 = vmul.f32 1.442695, %v988_v52 }
 0x226   :  { %v992_v55 = vmul.f32 1.442695, %v989_v53 }
 0x227   :  { %1049 = vpow2.f32 %v990_v54 }
 0x228   :  { %1051 = vpow2.f32 %v992_v55 }
 0x231   :  { %v1050_v56 = vpop.eup %1049 }
 0x232   :  { %v1052_v57 = vpop.eup %1051  ;;  %v994_v58 = vadd.f32 1.0, %v1050_v56 }
 0x233   :  { %v995_v59 = vadd.f32 1.0, %v1052_v57 }
 0x234   :  { %1053 = vrcp.f32 %v994_v58 }
 0x235   :  { %1055 = vrcp.f32 %v995_v59 }
 0x23e   :  { %v1054_v60 = vpop.eup %1053 }
 0x23f   :  { %v1056_v61 = vpop.eup %1055 }
 0x240   :  { %v1002_v62 = vcombine.low %v1054_v60, %v1056_v61 }
 0x242   :  { %1004 = vst [vmem:[#allocation5] sm:$0xff] %v1002_v62 }
 0x243   :  { %1090 = shalt.err (!%p1087_p12)
}
 0x244   :  { %s1091_s13 = scalar_lea.hbm %s1194_s5, 128 }
 0x245   :  { %p1092_p13 = scmp.ne.s32.totalorder %s1194_s5, %s1091_s13  ;;  %p1095_p0 = scmp.lt.u32.totalorder %s1091_s13, %s1194_s5 }
 0x247   :  { %p1097_p1 = pnand %p1095_p0, %p1092_p13 }
 0x249   :  { %1100 = shalt.err (!%p1097_p1)
}
 0x24a   :  { %1014 = dma.vmem_to_hbm [thread:$0]  %s1012_s4, 128, %s1194_s5, [#allocation4]  }
 0x24b   :  { %1103 = dma.done.wait [#allocation4], 128  }
 0x24c   :  { %1104 = vsyncadd [#allocation4], 4294967168 }
 0x24d   :  { %1018 = vsyncpa [#allocation3], 1 }
 0x24e   :  { %1019 = vsyncpa [#allocation4], 1 }

</bundles_post_ra>
